<compile_context>
chip_gen: v6e
topology: v6e:2x2x1
jax: 0.10.0
libtpu: 0.0.40
codegen_flags: <defaults>
</compile_context>

<pallas_src>
import jax
import jax.numpy as jnp
from jax.experimental import pallas as pl
from jax.experimental.pallas import tpu as pltpu


def _vu_ijcai_kernel(x_ref, wwt_ref, wb_ref, uwt_ref, fwt_ref, fb_ref, out_ref):
    # x_ref:   (Bb*T, Dp)   batch already folded into matmul rows by the wrapper
    # wwt_ref: (Dp, Dp)     W.weight^T   (zero-padded)
    # wb_ref:  (1, Dp)      W.bias       (zero-padded)
    # uwt_ref: (Dp, Lp)     U.weight^T   (zero-padded)
    # fwt_ref: (Dp, Lp)     final.weight^T (zero-padded)
    # fb_ref:  (1, Lp)      final.bias   (zero-padded)
    # out_ref: (Bb, Lp)
    Bb, Lp = out_ref.shape
    rows = x_ref.shape[0]
    T = rows // Bb
    mm_dt = wwt_ref.dtype           # matmul input dtype (f32, or bf16 on v6e/v7x)

    x2 = x_ref[...]                                                 # (Bb*T, Dp)

    # Z = tanh(x @ W^T + b_W)   (W pre-transposed & padded in the wrapper)
    z = jnp.tanh(
        jnp.dot(x2, wwt_ref[...], preferred_element_type=jnp.float32)
        + wb_ref[...]                                               # (1, Dp) broadcast
    )                                                               # (Bb*T, Dp) f32

    # Attention scores over the (lane-padded) label axis.
    scores = jnp.dot(z.astype(mm_dt), uwt_ref[...],
                     preferred_element_type=jnp.float32)            # (Bb*T, Lp)

    # proj[b*T+t, l] = sum_d x[b,t,d] * final_w[l,d]  -- one lane-dense MXU
    # matmul; replaces the (Bb, Lp, D) `hidden` tensor (exact reorder of sums).
    proj = jnp.dot(x2, fwt_ref[...],
                   preferred_element_type=jnp.float32)              # (Bb*T, Lp)

    # Split the leading dim back into (Bb, T, Lp): T rows = sublane axis,
    # Lp multiple of 128 lanes, so this is tile-aligned (no relayout copy).
    scores = scores.reshape(Bb, T, Lp)
    proj = proj.reshape(Bb, T, Lp)

    # Softmax over the sequence axis T, kept unnormalized; only the final
    # (Bb, Lp) logits are divided by the denominator.
    m = jnp.max(scores, axis=1, keepdims=True)                      # (Bb, 1, Lp)
    e = jnp.exp(scores - m)                                         # (Bb, T, Lp)
    denom = jnp.sum(e, axis=1)                                      # (Bb, Lp)
    logits_un = jnp.sum(e * proj, axis=1)                           # (Bb, Lp)

    # approx=True -> EUP vrcp slot (otherwise idle here); denom >= 1 so the
    # relative error is benign for logits.
    logits = logits_un * pl.reciprocal(denom, approx=True) + fb_ref[...]
    out_ref[...] = logits.astype(out_ref.dtype)


def _round_up(n, m):
    return ((n + m - 1) // m) * m


def _pick_block_b(B, T, target_rows=512):
    """Batch rows per grid step.

    Constraints: block_b divides B and (block_b % 8 == 0 or block_b == B), so
    the (block_b, Lp) output block is sublane-aligned or the full batch dim.
    Heuristic: as few grid steps as possible (per-step overhead ~0.35us,
    v5e/v6e have a single TensorCore); once block_b*T would exceed ~target_rows
    matmul rows, split into 8-aligned blocks so the grid pipelines and v7x's
    two TensorCores can share the "parallel" batch axis.
    """
    if B * T <= target_rows or B % 16 != 0:
        return B                                   # single grid step
    cap = max(8, (target_rows // max(T, 1)) // 8 * 8)
    start = min(cap, B // 2)
    for bb in range(start, 7, -8):
        if B % bb == 0:
            return bb
    return B


def vu_ijcai_forward(x, W_w, W_b, U_w, final_w, final_b, *,
                     block_b=None, use_bf16=False, single_buffer_weights=False):
    """x: (B, T, D) float32.  Returns logits (B, L) float32.

    use_bf16: feed bf16 matmul inputs (f32 accumulation). Only worth it on
    v6e/v7x once the matmuls are MXU-bound (large D / large block_b*T); keep
    False on v5e (no bf16 VPU path) and at small shapes.
    """
    B, T, D = x.shape
    L = U_w.shape[0]
    Lp = _round_up(L, 128)               # lane-dense label axis
    Dp = _round_up(D, 128)               # lane-dense feature axis (zero-padded)
    if block_b is None:
        block_b = _pick_block_b(B, T)
    assert B % block_b == 0, "block_b must divide B"
    assert block_b % 8 == 0 or block_b == B, \
        "block_b must be a multiple of 8 or the full batch (output tile rule)"

    mm_dt = jnp.bfloat16 if use_bf16 else jnp.float32

    # One-time wrapper-side layout prep (free XLA ops, not per-grid-step work):
    # fold batch into rows, zero-pad D->Dp and L->Lp, pre-transpose W / U /
    # final.weight.  tanh(0 + 0) = 0 and zero weight rows/cols keep the padded
    # lanes exactly zero, so results are unchanged; padding is sliced off below.
    x2 = jnp.zeros((B * T, Dp), mm_dt).at[:, :D].set(
        x.reshape(B * T, D).astype(mm_dt))                              # (B*T, Dp)
    W_wT = jnp.zeros((Dp, Dp), mm_dt).at[:D, :D].set(W_w.T.astype(mm_dt))
    W_b2 = jnp.zeros((1, Dp), jnp.float32).at[0, :D].set(W_b)
    U_wT = jnp.zeros((Dp, Lp), mm_dt).at[:D, :L].set(U_w.T.astype(mm_dt))
    f_wT = jnp.zeros((Dp, Lp), mm_dt).at[:D, :L].set(final_w.T.astype(mm_dt))
    fb_p = jnp.zeros((1, Lp), jnp.float32).at[0, :L].set(final_b)

    n_steps = B // block_b

    # Advisory cost estimate (invariant weights counted ONCE, not per step).
    mm_bytes = jnp.dtype(mm_dt).itemsize
    flops = int(2 * B * T * Dp * (Dp + 2 * Lp) + 4 * B * T * Lp)
    transcendentals = int(B * T * (Dp + Lp))             # tanh + exp
    bytes_accessed = int(
        mm_bytes * (B * T * Dp + Dp * Dp + 2 * Dp * Lp)  # x, W^T, U^T, fw^T
        + 4 * (Dp + Lp)                                  # biases
        + 4 * B * Lp)                                    # output

    def _w_spec(shape):
        if single_buffer_weights:
            # Grid-invariant blocks: no need to double-buffer (halves the weight
            # VMEM footprint; matters on v7x's 64 MiB VMEM at production sizes).
            return pl.BlockSpec(shape, lambda b: (0, 0),
                                pipeline_mode=pl.Buffered(1))
        return pl.BlockSpec(shape, lambda b: (0, 0))

    # TODO(synk): at production label-attention sizes (T, L in the thousands),
    # add a grid axis over Lp and an online-softmax loop over T so the working
    # set stays bounded (esp. on v7x's 64 MiB VMEM), and set vmem_limit_bytes.
    out = pl.pallas_call(
        _vu_ijcai_kernel,
        out_shape=jax.ShapeDtypeStruct((B, Lp), jnp.float32),
        grid=(n_steps,),
        in_specs=[
            pl.BlockSpec((block_b * T, Dp), lambda b: (b, 0)),  # x (batch-folded rows)
            _w_spec((Dp, Dp)),                                  # W.weight^T
            _w_spec((1, Dp)),                                   # W.bias
            _w_spec((Dp, Lp)),                                  # U.weight^T
            _w_spec((Dp, Lp)),                                  # final.weight^T
            _w_spec((1, Lp)),                                   # final.bias
        ],
        out_specs=pl.BlockSpec((block_b, Lp), lambda b: (b, 0)),
        compiler_params=pltpu.CompilerParams(
            dimension_semantics=("parallel",)),
        cost_estimate=pl.CostEstimate(flops=flops,
                                      transcendentals=transcendentals,
                                      bytes_accessed=bytes_accessed),
    )(x2, W_wT, W_b2, U_wT, f_wT, fb_p)

    return out[:, :L]                                   # drop label padding


def _xavier_uniform(key, shape):
    fan_out, fan_in = shape
    bound = (6.0 / (fan_in + fan_out)) ** 0.5
    return jax.random.uniform(key, shape, jnp.float32, -bound, bound)


def _linear_bias(key, fan_in, out_features):
    bound = 1.0 / (fan_in ** 0.5)
    return jax.random.uniform(key, (out_features,), jnp.float32, -bound, bound)


def _reference(x, W_w, W_b, U_w, final_w, final_b):
    Z = jnp.tanh(jnp.einsum("btd,ed->bte", x, W_w) + W_b)          # (B, T, D)
    scores = jnp.einsum("ld,btd->blt", U_w, Z)                     # (B, L, T)
    alpha = jax.nn.softmax(scores, axis=2)                         # (B, L, T)
    hidden = jnp.einsum("blt,btd->bld", alpha, x)                  # (B, L, D)
    return jnp.sum(final_w[None] * hidden, axis=2) + final_b       # (B, L)


if __name__ == "__main__":
    B, T, D, L = 4, 8, 32, 16   # batch, seq_len, input_dim, num_labels

    key = jax.random.PRNGKey(0)
    kx, kw, kwb, ku, kf, kfb = jax.random.split(key, 6)

    x = jax.random.normal(kx, (B, T, D), jnp.float32)
    W_w = _xavier_uniform(kw, (D, D))
    W_b = _linear_bias(kwb, D, D)
    U_w = _xavier_uniform(ku, (L, D))     # U.bias exists in the module but is unused in forward
    final_w = _xavier_uniform(kf, (L, D))
    final_b = _linear_bias(kfb, D, L)

    logits = vu_ijcai_forward(x, W_w, W_b, U_w, final_w, final_b)
    logits = jax.block_until_ready(logits)

    ref = _reference(x, W_w, W_b, U_w, final_w, final_b)
    assert logits.shape == (B, L)
    # approx EUP reciprocal + padded/reordered f32 matmuls -> slightly looser
    # tolerance than exact bit-match; agreement is still ~1e-4 level in practice.
    assert jnp.allclose(logits, ref, atol=2e-3, rtol=2e-3), "mismatch vs reference"

    print("KERNEL_OK")
</pallas_src>

<mosaic_0001>
module attributes {stable_mosaic.version = 11 : i64} {
  func.func @_vu_ijcai_kernel(%arg0: i32, %arg1: memref<32x128xf32, #tpu.memory_space<vmem>>, %arg2: memref<128x128xf32, #tpu.memory_space<vmem>>, %arg3: memref<1x128xf32, #tpu.memory_space<vmem>>, %arg4: memref<128x128xf32, #tpu.memory_space<vmem>>, %arg5: memref<128x128xf32, #tpu.memory_space<vmem>>, %arg6: memref<1x128xf32, #tpu.memory_space<vmem>>, %arg7: memref<4x128xf32, #tpu.memory_space<vmem>>) attributes {dimension_semantics = [#tpu.dimension_semantics<parallel>], iteration_bounds = array<i64: 1>, scalar_prefetch = 0 : i64, scratch_operands = 0 : i64, tpu.core_type = #tpu.core_type<tc>, window_params = [{transform_indices = @transform_0, window_bounds = array<i64: 32, 128>}, {pipeline_mode = #tpu.pipeline_mode<synchronous>, transform_indices = @transform_1, window_bounds = array<i64: 128, 128>}, {pipeline_mode = #tpu.pipeline_mode<synchronous>, transform_indices = @transform_2, window_bounds = array<i64: 1, 128>}, {pipeline_mode = #tpu.pipeline_mode<synchronous>, transform_indices = @transform_3, window_bounds = array<i64: 128, 128>}, {pipeline_mode = #tpu.pipeline_mode<synchronous>, transform_indices = @transform_4, window_bounds = array<i64: 128, 128>}, {pipeline_mode = #tpu.pipeline_mode<synchronous>, transform_indices = @transform_5, window_bounds = array<i64: 1, 128>}, {transform_indices = @transform_6, window_bounds = array<i64: 4, 128>}]} {
    %c0 = arith.constant 0 : index
    %c0_0 = arith.constant 0 : index
    %0 = vector.load %arg1[%c0, %c0_0] : memref<32x128xf32, #tpu.memory_space<vmem>>, vector<32x128xf32>
    %c0_1 = arith.constant 0 : index
    %c0_2 = arith.constant 0 : index
    %1 = vector.load %arg2[%c0_1, %c0_2] : memref<128x128xf32, #tpu.memory_space<vmem>>, vector<128x128xf32>
    %cst = arith.constant dense<0.000000e+00> : vector<32x128xf32>
    %2 = tpu.matmul %0, %1, %cst {dimension_numbers = #tpu.dot_dimension_numbers<[1], [0], [0], [1], [0, 0, 1, 1], [], []>} : vector<32x128xf32>, vector<128x128xf32>, vector<32x128xf32> -> vector<32x128xf32>
    %c0_3 = arith.constant 0 : index
    %c0_4 = arith.constant 0 : index
    %3 = vector.load %arg3[%c0_3, %c0_4] : memref<1x128xf32, #tpu.memory_space<vmem>>, vector<1x128xf32>
    %4 = vector.broadcast %3 : vector<1x128xf32> to vector<32x128xf32>
    %5 = arith.addf %2, %4 : vector<32x128xf32>
    %6 = math.tanh %5 : vector<32x128xf32>
    %c0_5 = arith.constant 0 : index
    %c0_6 = arith.constant 0 : index
    %7 = vector.load %arg4[%c0_5, %c0_6] : memref<128x128xf32, #tpu.memory_space<vmem>>, vector<128x128xf32>
    %cst_7 = arith.constant dense<0.000000e+00> : vector<32x128xf32>
    %8 = tpu.matmul %6, %7, %cst_7 {dimension_numbers = #tpu.dot_dimension_numbers<[1], [0], [0], [1], [0, 0, 1, 1], [], []>} : vector<32x128xf32>, vector<128x128xf32>, vector<32x128xf32> -> vector<32x128xf32>
    %c0_8 = arith.constant 0 : index
    %c0_9 = arith.constant 0 : index
    %9 = vector.load %arg5[%c0_8, %c0_9] : memref<128x128xf32, #tpu.memory_space<vmem>>, vector<128x128xf32>
    %cst_10 = arith.constant dense<0.000000e+00> : vector<32x128xf32>
    %10 = tpu.matmul %0, %9, %cst_10 {dimension_numbers = #tpu.dot_dimension_numbers<[1], [0], [0], [1], [0, 0, 1, 1], [], []>} : vector<32x128xf32>, vector<128x128xf32>, vector<32x128xf32> -> vector<32x128xf32>
    %11 = vector.shape_cast %8 : vector<32x128xf32> to vector<4x8x128xf32>
    %12 = vector.shape_cast %10 : vector<32x128xf32> to vector<4x8x128xf32>
    %cst_11 = arith.constant dense<0xFF800000> : vector<4x128xf32>
    %13 = vector.multi_reduction <maximumf>, %11, %cst_11 [1] : vector<4x8x128xf32> to vector<4x128xf32>
    %14 = vector.shape_cast %13 : vector<4x128xf32> to vector<4x1x128xf32>
    %15 = vector.broadcast %14 : vector<4x1x128xf32> to vector<4x8x128xf32>
    %16 = arith.subf %11, %15 : vector<4x8x128xf32>
    %17 = math.exp %16 : vector<4x8x128xf32>
    %cst_12 = arith.constant dense<0.000000e+00> : vector<4x128xf32>
    %18 = vector.multi_reduction <add>, %17, %cst_12 [1] : vector<4x8x128xf32> to vector<4x128xf32>
    %19 = arith.mulf %17, %12 : vector<4x8x128xf32>
    %cst_13 = arith.constant dense<0.000000e+00> : vector<4x128xf32>
    %20 = vector.multi_reduction <add>, %19, %cst_13 [1] : vector<4x8x128xf32> to vector<4x128xf32>
    %21 = tpu.reciprocal %18 {approx = true} : vector<4x128xf32> -> vector<4x128xf32>
    %22 = arith.mulf %20, %21 : vector<4x128xf32>
    %c0_14 = arith.constant 0 : index
    %c0_15 = arith.constant 0 : index
    %23 = vector.load %arg6[%c0_14, %c0_15] : memref<1x128xf32, #tpu.memory_space<vmem>>, vector<1x128xf32>
    %24 = vector.broadcast %23 : vector<1x128xf32> to vector<4x128xf32>
    %25 = arith.addf %22, %24 : vector<4x128xf32>
    %c0_16 = arith.constant 0 : index
    %c0_17 = arith.constant 0 : index
    %26 = vector.load %arg7[%c0_16, %c0_17] : memref<4x128xf32, #tpu.memory_space<vmem>>, vector<4x128xf32>
    tpu.vector_store %arg7[%c0_16, %c0_17], %25 {strides = array<i32>} : memref<4x128xf32, #tpu.memory_space<vmem>>, vector<4x128xf32>,
    return
  }
  func.func @transform_0(%arg0: i32) -> (i32, i32) {
    %c0_i32 = arith.constant 0 : i32
    %c0_i32_0 = arith.constant 0 : i32
    return %arg0, %c0_i32 : i32, i32
  }
  func.func @transform_1(%arg0: i32) -> (i32, i32) {
    %c0_i32 = arith.constant 0 : i32
    %c0_i32_0 = arith.constant 0 : i32
    %c0_i32_1 = arith.constant 0 : i32
    return %c0_i32, %c0_i32_0 : i32, i32
  }
  func.func @transform_2(%arg0: i32) -> (i32, i32) {
    %c0_i32 = arith.constant 0 : i32
    %c0_i32_0 = arith.constant 0 : i32
    %c0_i32_1 = arith.constant 0 : i32
    return %c0_i32, %c0_i32_0 : i32, i32
  }
  func.func @transform_3(%arg0: i32) -> (i32, i32) {
    %c0_i32 = arith.constant 0 : i32
    %c0_i32_0 = arith.constant 0 : i32
    %c0_i32_1 = arith.constant 0 : i32
    return %c0_i32, %c0_i32_0 : i32, i32
  }
  func.func @transform_4(%arg0: i32) -> (i32, i32) {
    %c0_i32 = arith.constant 0 : i32
    %c0_i32_0 = arith.constant 0 : i32
    %c0_i32_1 = arith.constant 0 : i32
    return %c0_i32, %c0_i32_0 : i32, i32
  }
  func.func @transform_5(%arg0: i32) -> (i32, i32) {
    %c0_i32 = arith.constant 0 : i32
    %c0_i32_0 = arith.constant 0 : i32
    %c0_i32_1 = arith.constant 0 : i32
    return %c0_i32, %c0_i32_0 : i32, i32
  }
  func.func @transform_6(%arg0: i32) -> (i32, i32) {
    %c0_i32 = arith.constant 0 : i32
    %c0_i32_0 = arith.constant 0 : i32
    return %arg0, %c0_i32 : i32, i32
  }
}

</mosaic_0001>

<bundles_post_ra>
// kernel: tpu_custom_call.1
= control target key start
LH: loop header
LB: loop body
LE: loop exit
PB: predicated region body
PF: predicated region fallthrough
CT: control target
= control target key end

     0   :  { %11 = vsyncpa [#allocation3], 0  ;;  %s1028_s0 = inlined_call_operand.hbm [shape: f32[32,128], index: 0, kind: input, shape index: {}]   ;;  %s1029_s1 = inlined_call_operand.hbm [shape: f32[128,128], index: 1, kind: input, shape index: {}]   ;;  %s1030_s2 = inlined_call_operand.vmem [shape: f32[1,128], index: 2, kind: input, shape index: {}]   ;;  %s1031_s3 = inlined_call_operand.hbm [shape: f32[128,128], index: 3, kind: input, shape index: {}]   ;;  %s1032_s4 = inlined_call_operand.hbm [shape: f32[128,128], index: 4, kind: input, shape index: {}]   ;;  %s1033_s5 = inlined_call_operand.vmem [shape: f32[1,128], index: 5, kind: input, shape index: {}]   ;;  %s1034_s6 = inlined_call_operand.hbm [shape: f32[4,128], index: 6, kind: output, shape index: {}]  }
   0x1   :  { %12 = vsyncpa [#allocation6], 0 }
   0x2   :  { %13 = vsyncpa [#allocation9], 0 }
   0x3   :  { %14 = vsyncpa [#allocation4], 0  ;;  %s883_s21 = smov [#allocation5]   ;;  %s884_s23 = smov [#allocation2]  }
   0x4   :  { %s32_s22 = sshll.u32 %s883_s21, 4  ;;  %s20_s24 = sshll.u32 %s884_s23, 4  ;;  %s33_s22 = int_to_ptr.vmem [resolvable:$true] %s32_s22  ;;  %s21_s24 = int_to_ptr.vmem [resolvable:$true] %s20_s24 }
   0x5   :  { %s783_s25 = scalar_lea.vmem %s33_s22, 2048  ;;  %p788_p1 = scmp.lt.s32.totalorder %s33_s22, %s33_s22 }
   0x6   :  { %p784_p0 = scmp.ne.s32.totalorder %s33_s22, %s783_s25  ;;  %p789_p2 = scmp.lt.s32.totalorder %s783_s25, %s783_s25 }
   0x8   :  { %p790_p3 = por %p789_p2, %p788_p1 }
   0xa   :  { %p791_p4 = pnand %p790_p3, %p784_p0 }
   0xc   :  { %794 = shalt.err (!%p791_p4)
}
   0xd   :  { %s885_s26 = smov 128   ;;  %s886_s27 = smov 8  }
   0xe   :  { %38 = dma.hbm_to_vmem [thread:$0]  %s1029_s1, 2048, %s33_s22, [#allocation6], %s885_s26, %s885_s26, %s886_s27  }
   0xf   :  { %s803_s30 = scalar_lea.vmem %s21_s24, 512  ;;  %p808_p6 = scmp.lt.s32.totalorder %s21_s24, %s21_s24 }
  0x10   :  { %p804_p5 = scmp.ne.s32.totalorder %s21_s24, %s803_s30  ;;  %p809_p7 = scmp.lt.s32.totalorder %s803_s30, %s803_s30 }
  0x12   :  { %p810_p8 = por %p809_p7, %p808_p6 }
  0x14   :  { %p811_p9 = pnand %p810_p8, %p804_p5 }
  0x16   :  { %814 = shalt.err (!%p811_p9)
}
  0x17   :  { %26 = dma.hbm_to_vmem [thread:$0]  %s1028_s0, 512, %s21_s24, [#allocation3], %s885_s26, %s885_s26, %s886_s27  }
  0x18   :  { %s887_s9 = smov [#allocation7]   ;;  %s888_s11 = smov [#allocation8]  }
  0x19   :  { %s46_s10 = sshll.u32 %s887_s9, 4  ;;  %s58_s12 = sshll.u32 %s888_s11, 4  ;;  %s47_s10 = int_to_ptr.vmem [resolvable:$true] %s46_s10  ;;  %s59_s12 = int_to_ptr.vmem [resolvable:$true] %s58_s12 }
  0x1a   :  { %s823_s1 = scalar_lea.vmem %s47_s10, 2048  ;;  %p828_p11 = scmp.lt.s32.totalorder %s47_s10, %s47_s10 }
  0x1b   :  { %p824_p10 = scmp.ne.s32.totalorder %s47_s10, %s823_s1  ;;  %p829_p12 = scmp.lt.s32.totalorder %s823_s1, %s823_s1 }
  0x1d   :  { %p830_p13 = por %p829_p12, %p828_p11 }
  0x1f   :  { %p831_p0 = pnand %p830_p13, %p824_p10 }
  0x21   :  { %834 = shalt.err (!%p831_p0)
}
  0x22   :  { %52 = dma.hbm_to_vmem [thread:$0]  %s1031_s3, 2048, %s47_s10, [#allocation6], %s885_s26, %s885_s26, %s886_s27  }
  0x23   :  { %s843_s0 = scalar_lea.vmem %s59_s12, 2048  ;;  %p848_p2 = scmp.lt.s32.totalorder %s59_s12, %s59_s12 }
  0x24   :  { %p844_p1 = scmp.ne.s32.totalorder %s59_s12, %s843_s0  ;;  %p849_p3 = scmp.lt.s32.totalorder %s843_s0, %s843_s0 }
  0x26   :  { %p850_p4 = por %p849_p3, %p848_p2 }
  0x28   :  { %p851_p5 = pnand %p850_p4, %p844_p1 }
  0x2a   :  { %854 = shalt.err (!%p851_p5)
}
  0x2b   :  { %64 = dma.hbm_to_vmem [thread:$0]  %s1032_s4, 2048, %s59_s12, [#allocation9], %s885_s26, %s885_s26, %s886_s27  }
  0x2c   :  { %875 = dma.done.wait [#allocation3], 512  }
  0x2d   :  { %876 = vsyncadd [#allocation3], 4294966784 }
  0x2e   :  { %877 = dma.done.wait [#allocation6], 4096  }
  0x2f   :  { %878 = vsyncadd [#allocation6], 4294963200 }
  0x30   :  { %879 = dma.done.wait [#allocation9], 2048  }
  0x31   :  { %880 = vsyncadd [#allocation9], 4294965248  ;;  %v98_v0 = vld [vmem:[#allocation5 + $0x78] sm:$0xff]  ;;  %v97_v1 = vld [vmem:[#allocation5 + $0x70] sm:$0xff]  ;;  %vm509_vm0 = vcmask 1041409   ;;  %vm512_vm1 = vcmask 1042434  }
  0x32   :  { %598 = vmatprep.subr.mxu0 %v98_v0  ;;  %v96_v2 = vld [vmem:[#allocation5 + $0x68] sm:$0xff]  ;;  %v95_v3 = vld [vmem:[#allocation5 + $0x60] sm:$0xff]  ;;  %v94_v5 = vld [vmem:[#allocation5 + $0x58] sm:$0xff]  ;;  %s889_s18 = smov [#allocation10]   ;;  %vm515_vm2 = vcmask 1043459  }
  0x33   :  { %599 = vmatpush3.msra.mxu0 %v98_v0  ;;  %v949_v4 = vld [vmem:[#allocation2] sm:$0xff]  ;;  %v210_v6 = vld [vmem:[#allocation7 + $0x78] sm:$0xff]  ;;  %v209_v7 = vld [vmem:[#allocation7 + $0x70] sm:$0xff]  ;;  %s525_s19 = sshll.u32 %s889_s18, 4  ;;  %s526_s19 = int_to_ptr.vmem [resolvable:$true] %s525_s19 }
  0x34   :  { %600 = vmatprep.subr.mxu0 %v97_v1  ;;  %630 = vmatprep.mubr.f32.mxu0 %v949_v4  ;;  %v93_v8 = vld [vmem:[#allocation5 + $0x50] sm:$0xff]  ;;  %v208_v9 = vld [vmem:[#allocation7 + $0x68] sm:$0xff]  ;;  %v207_v11 = vld [vmem:[#allocation7 + $0x60] sm:$0xff]  ;;  %p860_p7 = scmp.lt.s32.totalorder %s526_s19, %s526_s19 }
  0x35   :  { %601 = vmatpush3.msra.mxu0 %v97_v1  ;;  %636 = vmatprep.subr.mxu1 %v210_v6  ;;  %v92_v10 = vld [vmem:[#allocation5 + $0x48] sm:$0xff]  ;;  %v91_v12 = vld [vmem:[#allocation5 + $0x40] sm:$0xff]  ;;  %v206_v13 = vld [vmem:[#allocation7 + $0x58] sm:$0xff] }
  0x36   :  { %602 = vmatprep.subr.mxu0 %v96_v2  ;;  %637 = vmatpush3.msra.mxu1 %v210_v6  ;;  %v90_v14 = vld [vmem:[#allocation5 + $0x38] sm:$0xff]  ;;  %v205_v15 = vld [vmem:[#allocation7 + $0x50] sm:$0xff]  ;;  %v88_v17 = vld [vmem:[#allocation5 + $0x28] sm:$0xff] }
  0x37   :  { %603 = vmatpush3.msra.mxu0 %v96_v2  ;;  %638 = vmatprep.subr.mxu1 %v209_v7  ;;  %v89_v16 = vld [vmem:[#allocation5 + $0x30] sm:$0xff]  ;;  %v87_v18 = vld [vmem:[#allocation5 + $0x20] sm:$0xff]  ;;  %v86_v19 = vld [vmem:[#allocation5 + $0x18] sm:$0xff] }
  0x38   :  { %604 = vmatprep.subr.mxu0 %v95_v3  ;;  %639 = vmatpush3.msra.mxu1 %v209_v7  ;;  %v85_v20 = vld [vmem:[#allocation5 + $0x10] sm:$0xff]  ;;  %v84_v21 = vld [vmem:[#allocation5 + $0x8] sm:$0xff]  ;;  %v83_v22 = vld [vmem:[#allocation5] sm:$0xff] }
  0x39   :  { %605 = vmatpush3.msra.mxu0 %v95_v3  ;;  %640 = vmatprep.subr.mxu1 %v208_v9  ;;  %v952_v23 = vld [vmem:[#allocation2 + $0x8] sm:$0xff]  ;;  %v954_v24 = vld [vmem:[#allocation2 + $0x10] sm:$0xff]  ;;  %v958_v25 = vld [vmem:[#allocation2 + $0x18] sm:$0xff] }
  0x3a   :  { %606 = vmatprep.subr.mxu0 %v94_v5  ;;  %641 = vmatpush3.msra.mxu1 %v208_v9  ;;  %v204_v26 = vld [vmem:[#allocation7 + $0x48] sm:$0xff]  ;;  %v203_v27 = vld [vmem:[#allocation7 + $0x40] sm:$0xff]  ;;  %v202_v28 = vld [vmem:[#allocation7 + $0x38] sm:$0xff] }
  0x3b   :  { %607 = vmatpush3.msra.mxu0 %v94_v5  ;;  %642 = vmatprep.subr.mxu1 %v207_v11  ;;  %v201_v29 = vld [vmem:[#allocation7 + $0x30] sm:$0xff]  ;;  %v200_v30 = vld [vmem:[#allocation7 + $0x28] sm:$0xff]  ;;  %v199_v31 = vld [vmem:[#allocation7 + $0x20] sm:$0xff] }
  0x3c   :  { %608 = vmatprep.subr.mxu0 %v93_v8  ;;  %643 = vmatpush3.msra.mxu1 %v207_v11  ;;  %v198_v32 = vld [vmem:[#allocation7 + $0x18] sm:$0xff]  ;;  %v197_v34 = vld [vmem:[#allocation7 + $0x10] sm:$0xff]  ;;  %v196_v35 = vld [vmem:[#allocation7 + $0x8] sm:$0xff] }
  0x3d   :  { %609 = vmatpush3.msra.mxu0 %v93_v8  ;;  %644 = vmatprep.subr.mxu1 %v206_v13  ;;  %v962_v33 = vld [vmem:[#allocation8 + $0x78] sm:$0xff]  ;;  %v195_v36 = vld [vmem:[#allocation7] sm:$0xff]  ;;  %v966_v37 = vld [vmem:[#allocation8 + $0x70] sm:$0xff] }
  0x3e   :  { %610 = vmatprep.subr.mxu0 %v92_v10  ;;  %645 = vmatpush3.msra.mxu1 %v206_v13  ;;  %v970_v38 = vld [vmem:[#allocation8 + $0x68] sm:$0xff]  ;;  %v975_v39 = vld [vmem:[#allocation8 + $0x60] sm:$0xff]  ;;  %v978_v40 = vld [vmem:[#allocation8 + $0x58] sm:$0xff] }
  0x3f   :  { %611 = vmatpush3.msra.mxu0 %v92_v10  ;;  %646 = vmatprep.subr.mxu1 %v205_v15  ;;  %v982_v41 = vld [vmem:[#allocation8 + $0x50] sm:$0xff]  ;;  %v986_v42 = vld [vmem:[#allocation8 + $0x48] sm:$0xff]  ;;  %v990_v43 = vld [vmem:[#allocation8 + $0x40] sm:$0xff] }
  0x40   :  { %612 = vmatprep.subr.mxu0 %v91_v12  ;;  %647 = vmatpush3.msra.mxu1 %v205_v15  ;;  %v994_v44 = vld [vmem:[#allocation8 + $0x38] sm:$0xff]  ;;  %v302_v45 = vld [vmem:[#allocation8 + $0x30] sm:$0xff]  ;;  %v301_v46 = vld [vmem:[#allocation8 + $0x28] sm:$0xff] }
  0x41   :  { %613 = vmatpush3.msra.mxu0 %v91_v12  ;;  %648 = vmatprep.subr.mxu1 %v204_v26  ;;  %v300_v47 = vld [vmem:[#allocation8 + $0x20] sm:$0xff]  ;;  %v299_v48 = vld [vmem:[#allocation8 + $0x18] sm:$0xff]  ;;  %v298_v49 = vld [vmem:[#allocation8 + $0x10] sm:$0xff] }
  0x42   :  { %614 = vmatprep.subr.mxu0 %v90_v14  ;;  %649 = vmatpush3.msra.mxu1 %v204_v26  ;;  %v297_v50 = vld [vmem:[#allocation8 + $0x8] sm:$0xff]  ;;  %v296_v51 = vld [vmem:[#allocation8] sm:$0xff] }
  0x43   :  { %615 = vmatpush3.msra.mxu0 %v90_v14  ;;  %650 = vmatprep.subr.mxu1 %v203_v27  ;;  %v536_v52 = vld [vmem:[%s1030_s2] ss:$0 sm:$0xff] }
  0x44   :  { %616 = vmatprep.subr.mxu0 %v89_v16  ;;  %651 = vmatpush3.msra.mxu1 %v203_v27 }
  0x45   :  { %617 = vmatpush3.msra.mxu0 %v89_v16  ;;  %652 = vmatprep.subr.mxu1 %v202_v28 }
  0x46   :  { %618 = vmatprep.subr.mxu0 %v88_v17  ;;  %653 = vmatpush3.msra.mxu1 %v202_v28 }
  0x47   :  { %619 = vmatpush3.msra.mxu0 %v88_v17  ;;  %654 = vmatprep.subr.mxu1 %v201_v29 }
  0x48   :  { %620 = vmatprep.subr.mxu0 %v87_v18  ;;  %655 = vmatpush3.msra.mxu1 %v201_v29 }
  0x49   :  { %621 = vmatpush3.msra.mxu0 %v87_v18  ;;  %656 = vmatprep.subr.mxu1 %v200_v30 }
  0x4a   :  { %622 = vmatprep.subr.mxu0 %v86_v19  ;;  %657 = vmatpush3.msra.mxu1 %v200_v30 }
  0x4b   :  { %623 = vmatpush3.msra.mxu0 %v86_v19  ;;  %658 = vmatprep.subr.mxu1 %v199_v31 }
  0x4c   :  { %624 = vmatprep.subr.mxu0 %v85_v20  ;;  %659 = vmatpush3.msra.mxu1 %v199_v31 }
  0x4d   :  { %625 = vmatpush3.msra.mxu0 %v85_v20  ;;  %660 = vmatprep.subr.mxu1 %v198_v32 }
  0x4e   :  { %626 = vmatprep.subr.mxu0 %v84_v21  ;;  %661 = vmatpush3.msra.mxu1 %v198_v32 }
  0x4f   :  { %627 = vmatpush3.msra.mxu0 %v84_v21  ;;  %662 = vmatprep.subr.mxu1 %v197_v34 }
  0x50   :  { %628 = vmatprep.subr.mxu0 %v83_v22  ;;  %663 = vmatpush3.msra.mxu1 %v197_v34 }
  0x51   :  { %629 = vmatpush3.msra.mxu0 %v83_v22  ;;  %664 = vmatprep.subr.mxu1 %v196_v35 }
  0x52   :  { %631 = vmatmul.mubr.f32.vlgmr.msra.gmra.mxu0 %v952_v23  ;;  %674 = vmatprep.subr.mxu0 %v962_v33 }
  0x53   :  { %633 = vmatprep.mubr.f32.mxu0 %v954_v24  ;;  %675 = vmatpush3.msra.mxu0 %v962_v33 }
  0x54   :  { %665 = vmatpush3.msra.mxu1 %v196_v35  ;;  %676 = vmatprep.subr.mxu0 %v966_v37 }
  0x55   :  { %666 = vmatprep.subr.mxu1 %v195_v36  ;;  %677 = vmatpush3.msra.mxu0 %v966_v37 }
  0x56   :  { %634 = vmatmul.mubr.f32.gmra.mxu0 %v958_v25  ;;  %667 = vmatpush3.msra.mxu1 %v195_v36 }
  0x57   :  { %706 = vmatprep.mubr.f32.mxu0 %v949_v4  ;;  %712 = vmatprep.subr.mxu1 %v962_v33 }
  0x58   :  { %678 = vmatprep.subr.mxu0 %v970_v38 }
  0x59   :  { %679 = vmatpush3.msra.mxu0 %v970_v38 }
  0x5a   :  { %680 = vmatprep.subr.mxu0 %v975_v39 }
  0x5b   :  { %681 = vmatpush3.msra.mxu0 %v975_v39 }
  0x5c   :  { %682 = vmatprep.subr.mxu0 %v978_v40 }
  0x5d   :  { %683 = vmatpush3.msra.mxu0 %v978_v40 }
  0x5e   :  { %684 = vmatprep.subr.mxu0 %v982_v41 }
  0x5f   :  { %685 = vmatpush3.msra.mxu0 %v982_v41 }
  0x60   :  { %686 = vmatprep.subr.mxu0 %v986_v42 }
  0x61   :  { %687 = vmatpush3.msra.mxu0 %v986_v42 }
  0x62   :  { %688 = vmatprep.subr.mxu0 %v990_v43 }
  0x63   :  { %689 = vmatpush3.msra.mxu0 %v990_v43 }
  0x64   :  { %690 = vmatprep.subr.mxu0 %v994_v44 }
  0x65   :  { %691 = vmatpush3.msra.mxu0 %v994_v44 }
  0x66   :  { %692 = vmatprep.subr.mxu0 %v302_v45 }
  0x67   :  { %693 = vmatpush3.msra.mxu0 %v302_v45 }
  0x68   :  { %694 = vmatprep.subr.mxu0 %v301_v46 }
  0x69   :  { %695 = vmatpush3.msra.mxu0 %v301_v46 }
  0x6a   :  { %696 = vmatprep.subr.mxu0 %v300_v47 }
  0x6b   :  { %697 = vmatpush3.msra.mxu0 %v300_v47 }
  0x6c   :  { %698 = vmatprep.subr.mxu0 %v299_v48 }
  0x6d   :  { %699 = vmatpush3.msra.mxu0 %v299_v48 }
  0x6e   :  { %700 = vmatprep.subr.mxu0 %v298_v49 }
  0x6f   :  { %701 = vmatpush3.msra.mxu0 %v298_v49 }
  0x70   :  { %702 = vmatprep.subr.mxu0 %v297_v50 }
  0x71   :  { %703 = vmatpush3.msra.mxu0 %v297_v50 }
  0x72   :  { %704 = vmatprep.subr.mxu0 %v296_v51 }
  0x73   :  { %705 = vmatpush3.msra.mxu0 %v296_v51 }
  0x74   :  { %707 = vmatmul.mubr.f32.vlgmr.msra.gmra.mxu0 %v952_v23 }
 0x112   :  { %v632_v53 = vpop.f32.mrf.mxu0 }
 0x113   :  { %v178_v54 = vadd.f32 %v632_v53, %v536_v52 }
 0x114   :  { %v172_v55 = vpop.f32.mrf.mxu0 }
 0x115   :  { %v173_v56 = vadd.f32 %v536_v52, %v172_v55 }
 0x116   :  { %v635_v57 = vpop.f32.mrf.mxu0 }
 0x117   :  { %751 = vtanh.f32 %v173_v56  ;;  %v188_v58 = vadd.f32 %v635_v57, %v536_v52 }
 0x118   :  { %753 = vtanh.f32 %v178_v54  ;;  %v182_v59 = vpop.f32.mrf.mxu0 }
 0x119   :  { %v183_v60 = vadd.f32 %v536_v52, %v182_v59 }
 0x11b   :  { %755 = vtanh.f32 %v183_v60 }
 0x11c   :  { %757 = vtanh.f32 %v188_v58 }
 0x124   :  { %v752_v61 = vpop.eup %751 }
 0x125   :  { %v754_v62 = vpop.eup %753  ;;  %668 = vmatprep.mubr.f32.mxu1 %v752_v61 }
 0x126   :  { %669 = vmatmul.mubr.f32.vlgmr.msra.gmra.mxu1 %v754_v62 }
 0x127   :  { %728 = vmatpush3.msra.mxu1 %v962_v33 }
 0x128   :  { %v756_v63 = vpop.eup %755  ;;  %713 = vmatprep.subr.mxu1 %v966_v37 }
 0x129   :  { %v758_v0 = vpop.eup %757  ;;  %671 = vmatprep.mubr.f32.mxu1 %v756_v63  ;;  %729 = vmatpush3.msra.mxu1 %v966_v37 }
 0x12a   :  { %672 = vmatmul.mubr.f32.gmra.mxu1 %v758_v0  ;;  %714 = vmatprep.subr.mxu1 %v970_v38 }
 0x12b   :  { %730 = vmatpush3.msra.mxu1 %v970_v38  ;;  %709 = vmatprep.mubr.f32.mxu1 %v954_v24 }
 0x12c   :  { %715 = vmatprep.subr.mxu1 %v975_v39 }
 0x12d   :  { %731 = vmatpush3.msra.mxu1 %v975_v39 }
 0x12e   :  { %716 = vmatprep.subr.mxu1 %v978_v40 }
 0x12f   :  { %732 = vmatpush3.msra.mxu1 %v978_v40 }
 0x130   :  { %717 = vmatprep.subr.mxu1 %v982_v41 }
 0x131   :  { %733 = vmatpush3.msra.mxu1 %v982_v41 }
 0x132   :  { %718 = vmatprep.subr.mxu1 %v986_v42 }
 0x133   :  { %734 = vmatpush3.msra.mxu1 %v986_v42 }
 0x134   :  { %719 = vmatprep.subr.mxu1 %v990_v43  ;;  %v708_v37 = vpop.f32.mrf.mxu0 }
 0x135   :  { %735 = vmatpush3.msra.mxu1 %v990_v43 }
 0x136   :  { %720 = vmatprep.subr.mxu1 %v994_v44  ;;  %v378_v42 = vpop.f32.mrf.mxu0 }
 0x137   :  { %736 = vmatpush3.msra.mxu1 %v994_v44 }
 0x138   :  { %721 = vmatprep.subr.mxu1 %v302_v45 }
 0x139   :  { %737 = vmatpush3.msra.mxu1 %v302_v45 }
 0x13a   :  { %722 = vmatprep.subr.mxu1 %v301_v46 }
 0x13b   :  { %738 = vmatpush3.msra.mxu1 %v301_v46 }
 0x13c   :  { %723 = vmatprep.subr.mxu1 %v300_v47 }
 0x13d   :  { %739 = vmatpush3.msra.mxu1 %v300_v47 }
 0x13e   :  { %724 = vmatprep.subr.mxu1 %v299_v48 }
 0x13f   :  { %740 = vmatpush3.msra.mxu1 %v299_v48 }
 0x140   :  { %725 = vmatprep.subr.mxu1 %v298_v49 }
 0x141   :  { %741 = vmatpush3.msra.mxu1 %v298_v49 }
 0x142   :  { %726 = vmatprep.subr.mxu1 %v297_v50 }
 0x143   :  { %742 = vmatpush3.msra.mxu1 %v297_v50 }
 0x144   :  { %727 = vmatprep.subr.mxu1 %v296_v51 }
 0x145   :  { %743 = vmatpush3.msra.mxu1 %v296_v51 }
 0x146   :  { %710 = vmatmul.mubr.f32.vlgmr.msra.gmra.mxu1 %v958_v25 }
 0x1e6   :  { %v670_v1 = vpop.f32.mrf.mxu1 }
 0x1e7   :  { %v403_v2 = vrot.slane %v670_v1, 4 }
 0x1e8   :  { %v277_v3 = vpop.f32.mrf.mxu1 }
 0x1e9   :  { %v404_v4 = vmax.f32 %v670_v1, %v403_v2  ;;  %v397_v5 = vrot.slane %v277_v3, 4 }
 0x1ea   :  { %v673_v6 = vpop.f32.mrf.mxu1 }
 0x1eb   :  { %v405_v7 = vrot.slane %v404_v4, 2  ;;  %v398_v8 = vmax.f32 %v277_v3, %v397_v5  ;;  %v415_v9 = vrot.slane %v673_v6, 4 }
 0x1ec   :  { %v287_v10 = vpop.f32.mrf.mxu1 }
 0x1ed   :  { %v406_v11 = vmax.f32 %v404_v4, %v405_v7  ;;  %v399_v12 = vrot.slane %v398_v8, 2  ;;  %v416_v13 = vmax.f32 %v673_v6, %v415_v9  ;;  %v409_v14 = vrot.slane %v287_v10, 4 }
 0x1ef   :  { %v407_v15 = vrot.slane %v406_v11, 1  ;;  %v400_v16 = vmax.f32 %v398_v8, %v399_v12  ;;  %v417_v17 = vrot.slane %v416_v13, 2  ;;  %v410_v18 = vmax.f32 %v287_v10, %v409_v14 }
 0x1f1   :  { %v408_v19 = vmax.f32 %v406_v11, %v407_v15  ;;  %v401_v20 = vrot.slane %v400_v16, 1  ;;  %v418_v21 = vmax.f32 %v416_v13, %v417_v17  ;;  %v411_v22 = vrot.slane %v410_v18, 2 }
 0x1f3   :  { %v422_v23 = vsub.f32 %v670_v1, %v408_v19  ;;  %v402_v24 = vmax.f32 %v400_v16, %v401_v20  ;;  %v419_v25 = vrot.slane %v418_v21, 1  ;;  %v412_v26 = vmax.f32 %v410_v18, %v411_v22 }
 0x1f5   :  { %v427_v27 = vmul.f32 1.442695, %v422_v23  ;;  %v421_v28 = vsub.f32 %v277_v3, %v402_v24  ;;  %v420_v29 = vmax.f32 %v418_v21, %v419_v25  ;;  %v413_v30 = vrot.slane %v412_v26, 1 }
 0x1f7   :  { %759 = vpow2.f32 %v427_v27  ;;  %v425_v31 = vmul.f32 1.442695, %v421_v28  ;;  %v424_v32 = vsub.f32 %v673_v6, %v420_v29  ;;  %v414_v33 = vmax.f32 %v412_v26, %v413_v30 }
 0x1f9   :  { %761 = vpow2.f32 %v425_v31  ;;  %v431_v34 = vmul.f32 1.442695, %v424_v32  ;;  %v423_v35 = vsub.f32 %v287_v10, %v414_v33  ;;  %v537_v32 = vld [vmem:[%s1033_s5] ss:$0 sm:$0xff]  ;;  %s855_s5 = scalar_lea.vmem %s526_s19, 64 }
 0x1fa   :  { %p856_p6 = scmp.ne.s32.totalorder %s526_s19, %s855_s5  ;;  %p861_p8 = scmp.lt.s32.totalorder %s855_s5, %s855_s5 }
 0x1fb   :  { %763 = vpow2.f32 %v431_v34  ;;  %v429_v36 = vmul.f32 1.442695, %v423_v35 }
 0x1fc   :  { %p862_p9 = por %p861_p8, %p860_p7 }
 0x1fd   :  { %765 = vpow2.f32 %v429_v36 }
 0x1fe   :  { %p863_p10 = pnand %p862_p9, %p856_p6 }
 0x204   :  { %v760_v38 = vpop.eup %759 }
 0x205   :  { %v439_v39 = vrot.slane %v760_v38, 4  ;;  %v458_v40 = vmul.f32 %v760_v38, %v708_v37 }
 0x206   :  { %v762_v41 = vpop.eup %761  ;;  %v711_v43 = vpop.f32.mrf.mxu1 }
 0x207   :  { %v440_v44 = vadd.f32 %v760_v38, %v439_v39  ;;  %v433_v45 = vrot.slane %v762_v41, 4  ;;  %v467_v48 = vrot.slane %v458_v40, 4  ;;  %v457_v50 = vmul.f32 %v762_v41, %v378_v42 }
 0x208   :  { %v764_v46 = vpop.eup %763  ;;  %v388_v51 = vpop.f32.mrf.mxu1 }
 0x209   :  { %v441_v47 = vrot.slane %v440_v44, 2  ;;  %v434_v49 = vadd.f32 %v762_v41, %v433_v45  ;;  %v451_v53 = vrot.slane %v764_v46, 4  ;;  %v460_v54 = vmul.f32 %v764_v46, %v711_v43 }
 0x20a   :  { %v766_v52 = vpop.eup %765  ;;  %v468_v61 = vadd.f32 %v467_v48, %v458_v40  ;;  %v461_v63 = vrot.slane %v457_v50, 4 }
 0x20b   :  { %v442_v55 = vadd.f32 %v441_v47, %v440_v44  ;;  %v435_v56 = vrot.slane %v434_v49, 2  ;;  %v452_v57 = vadd.f32 %v764_v46, %v451_v53  ;;  %v445_v58 = vrot.slane %v766_v52, 4 }
 0x20c   :  { %v459_v59 = vmul.f32 %v766_v52, %v388_v51  ;;  %v479_v1 = vrot.slane %v460_v54, 4  ;;  %v469_v8 = vrot.slane %v468_v61, 2  ;;  %v462_v10 = vadd.f32 %v461_v63, %v457_v50 }
 0x20d   :  { %v443_v60 = vrot.slane %v442_v55, 1  ;;  %v436_v62 = vadd.f32 %v435_v56, %v434_v49  ;;  %v453_v0 = vrot.slane %v452_v57, 2  ;;  %v446_v2 = vadd.f32 %v766_v52, %v445_v58 }
 0x20e   :  { %v473_v7 = vrot.slane %v459_v59, 4  ;;  %v480_v12 = vadd.f32 %v479_v1, %v460_v54  ;;  %v470_v17 = vadd.f32 %v469_v8, %v468_v61  ;;  %v463_v18 = vrot.slane %v462_v10, 2 }
 0x20f   :  { %v444_v3 = vadd.f32 %v443_v60, %v442_v55  ;;  %v437_v4 = vrot.slane %v436_v62, 1  ;;  %v454_v5 = vadd.f32 %v453_v0, %v452_v57  ;;  %v447_v6 = vrot.slane %v446_v2, 2 }
 0x210   :  { %v474_v16 = vadd.f32 %v473_v7, %v459_v59  ;;  %v481_v19 = vrot.slane %v480_v12, 2  ;;  %v471_v22 = vrot.slane %v470_v17, 1  ;;  %v464_v23 = vadd.f32 %v463_v18, %v462_v10 }
 0x211   :  { %767 = vrcp.f32 %v444_v3  ;;  %v438_v9 = vadd.f32 %v437_v4, %v436_v62  ;;  %v455_v11 = vrot.slane %v454_v5, 1  ;;  %v448_v13 = vadd.f32 %v447_v6, %v446_v2 }
 0x212   :  { %v475_v21 = vrot.slane %v474_v16, 2  ;;  %v482_v24 = vadd.f32 %v481_v19, %v480_v12  ;;  %v472_v26 = vadd.f32 %v471_v22, %v470_v17  ;;  %v465_v27 = vrot.slane %v464_v23, 1 }
 0x213   :  { %769 = vrcp.f32 %v438_v9  ;;  %v456_v14 = vadd.f32 %v455_v11, %v454_v5  ;;  %v449_v15 = vrot.slane %v448_v13, 1 }
 0x214   :  { %v476_v25 = vadd.f32 %v475_v21, %v474_v16  ;;  %v483_v29 = vrot.slane %v482_v24, 1  ;;  %v466_v34 = vadd.f32 %v465_v27, %v464_v23 }
 0x215   :  { %771 = vrcp.f32 %v456_v14  ;;  %v450_v20 = vadd.f32 %v449_v15, %v448_v13 }
 0x216   :  { %v477_v33 = vrot.slane %v476_v25, 1  ;;  %v484_v35 = vadd.f32 %v483_v29, %v482_v24 }
 0x217   :  { %773 = vrcp.f32 %v450_v20 }
 0x218   :  { %v478_v40 = vadd.f32 %v477_v33, %v476_v25 }
 0x21e   :  { %v768_v28 = vpop.eup %767 }
 0x21f   :  { %v490_v30 = vmul.f32 %v768_v28, %v472_v26 }
 0x220   :  { %v770_v31 = vpop.eup %769 }
 0x221   :  { %v501_v37 = vadd.f32 %v537_v32, %v490_v30  ;;  %v489_v38 = vmul.f32 %v770_v31, %v466_v34 }
 0x222   :  { %v772_v36 = vpop.eup %771 }
 0x223   :  { %v492_v39 = vmul.f32 %v772_v36, %v484_v35  ;;  %v508_v43 = vrot.slane %v501_v37, 7  ;;  %v500_v44 = vadd.f32 %v537_v32, %v489_v38 }
 0x224   :  { %v774_v41 = vpop.eup %773 }
 0x225   :  { %v491_v42 = vmul.f32 %v774_v41, %v478_v40  ;;  %v503_v45 = vadd.f32 %v537_v32, %v492_v39  ;;  %v510_v48 = vsel %vm509_vm0, %v508_v43, %v500_v44 }
 0x227   :  { %v502_v46 = vadd.f32 %v537_v32, %v491_v42  ;;  %v514_v49 = vrot.slane %v503_v45, 5 }
 0x229   :  { %v511_v47 = vrot.slane %v502_v46, 6 }
 0x22b   :  { %v513_v50 = vsel %vm512_vm1, %v511_v47, %v510_v48 }
 0x22c   :  { %v516_v51 = vsel %vm515_vm2, %v514_v49, %v513_v50 }
 0x22d   :  { %518 = vst [vmem:[#allocation10] sm:$0xf] %v516_v51 }
 0x22e   :  { %866 = shalt.err (!%p863_p10)
}
 0x22f   :  { %528 = dma.vmem_to_hbm [thread:$0]  %s526_s19, 64, %s1034_s6, [#allocation4]  }
 0x230   :  { %881 = dma.done.wait [#allocation4], 64  }
 0x231   :  { %882 = vsyncadd [#allocation4], 4294967232 }
 0x232   :  { %532 = vsyncpa [#allocation3], 1 }
 0x233   :  { %533 = vsyncpa [#allocation6], 1 }
 0x234   :  { %534 = vsyncpa [#allocation9], 1 }
 0x235   :  { %535 = vsyncpa [#allocation4], 1 }

</bundles_post_ra>
